<compile_context>
chip_gen: v7x
topology: tpu7x:2x2x1
jax: 0.10.0
libtpu: 0.0.40
codegen_flags: <defaults>
</compile_context>

<pallas_src>
import math

import jax
import jax.numpy as jnp
from jax import lax
from jax.experimental import pallas as pl
from jax.experimental.pallas import tpu as pltpu

# config choices mirroring preprocess_config['preprocessing'][...]['feature']
PITCH_FEATURE_LEVEL = "phoneme_level"
ENERGY_FEATURE_LEVEL = "frame_level"

# Target mel frames per grid step. At B=16, n_mels=80, f32 this is ~2.6 MB per mel tensor
# per buffer -> ~10.5 MB double-buffered for both tensors: comfortably inside v7x's 64 MiB
# VMEM (32 MiB scoped default) while amortizing the ~0.35 us per-step overhead.
_TARGET_TILE_FRAMES = 512

# SMEM accumulator slots
_ACC_MEL, _ACC_PITCH, _ACC_ENERGY, _ACC_DUR, _ACC_NOISE = range(5)


def _make_kernel(n_mels, tile_frames, noise_size, pitch_phoneme, energy_phoneme):
    inv_n_mels = 1.0 / float(n_mels)
    inv_noise = 1.0 / float(noise_size)

    def kernel(src_len_ref, mel_len_ref,        # (B, 1) int32, resident
               mel_tgt_ref, mel_ss_ref,         # (B, tile_frames*n_mels), tiled over frames
               pitch_p_ref, pitch_t_ref,        # (B, T_pitch), resident
               energy_p_ref, energy_t_ref,      # (B, T_energy), resident
               logdur_p_ref, dur_t_ref,         # (B, T_src), resident
               noise_ref,                       # (B, T_noise), resident
               out_ref,                         # (7,) f32 SMEM output
               acc_ref):                        # (8,) f32 SMEM scratch accumulators
        f32 = jnp.float32
        t = pl.program_id(0)

        src_len = src_len_ref[...]              # (B, 1) int32
        mel_len = mel_len_ref[...]              # (B, 1) int32

        def valid(shape, lens):
            pos = lax.broadcasted_iota(jnp.int32, shape, 1)
            return (pos < lens).astype(f32)

        # ---- one-time work: accumulator init + small per-position streams --------------
        @pl.when(t == 0)
        def _init():
            acc_ref[_ACC_MEL] = jnp.float32(0.0)

            p_valid = valid(pitch_p_ref.shape, src_len if pitch_phoneme else mel_len)
            pd = pitch_p_ref[...].astype(f32) - pitch_t_ref[...].astype(f32)
            acc_ref[_ACC_PITCH] = jnp.sum(pd * pd * p_valid)

            e_valid = valid(energy_p_ref.shape, src_len if energy_phoneme else mel_len)
            ed = energy_p_ref[...].astype(f32) - energy_t_ref[...].astype(f32)
            acc_ref[_ACC_ENERGY] = jnp.sum(ed * ed * e_valid)

            d_valid = valid(logdur_p_ref.shape, src_len)
            logdur_tgt = jnp.log(dur_t_ref[...].astype(f32) + 1.0)
            dd = logdur_p_ref[...].astype(f32) - logdur_tgt
            acc_ref[_ACC_DUR] = jnp.sum(dd * dd * d_valid)

            acc_ref[_ACC_NOISE] = jnp.sum(noise_ref[...].astype(f32))

        # ---- per-tile mel L1 partial sum (lane-dense flattened layout) ------------------
        # valid elements in this tile form a per-row prefix of length valid_frames * n_mels
        valid_frames = jnp.clip(mel_len - t * tile_frames, 0, tile_frames)    # (B, 1) int32
        flat_pos = lax.broadcasted_iota(jnp.int32, mel_tgt_ref.shape, 1)
        m_mask = (flat_pos < valid_frames * n_mels).astype(f32)
        diff = mel_ss_ref[...].astype(f32) - mel_tgt_ref[...].astype(f32)
        acc_ref[_ACC_MEL] = acc_ref[_ACC_MEL] + jnp.sum(jnp.abs(diff) * m_mask)

        # ---- finalize on the last tile ---------------------------------------------------
        @pl.when(t == pl.num_programs(0) - 1)
        def _fin():
            n_src = jnp.sum(src_len.astype(f32))
            n_mel = jnp.sum(mel_len.astype(f32))
            inv_src = 1.0 / n_src      # each count's reciprocal computed once (epilogue only)
            inv_mel = 1.0 / n_mel

            mel_loss = acc_ref[_ACC_MEL] * inv_mel * inv_n_mels
            pitch_loss = acc_ref[_ACC_PITCH] * (inv_src if pitch_phoneme else inv_mel)
            energy_loss = acc_ref[_ACC_ENERGY] * (inv_src if energy_phoneme else inv_mel)
            duration_loss = acc_ref[_ACC_DUR] * inv_src
            noise_loss = acc_ref[_ACC_NOISE] * inv_noise
            total = mel_loss + duration_loss + pitch_loss + energy_loss + noise_loss

            out_ref[0] = total
            out_ref[1] = mel_loss
            out_ref[2] = mel_loss          # mel_diffusion_loss == mel_loss (module quirk)
            out_ref[3] = pitch_loss
            out_ref[4] = energy_loss
            out_ref[5] = duration_loss
            out_ref[6] = noise_loss

    return kernel


# TODO(synk): arbitrary (non-prefix) boolean masked_select masks are not supported — the
# kernel takes per-sequence lengths (the standard FastSpeech2 padding-mask convention).
@jax.jit
def fastspeech2_loss(mel_targets, mel_pred_stylespeech, mel_pred_diffusion,
                     epsilon_denoise_prediction, pitch_predictions, pitch_targets,
                     energy_predictions, energy_targets, log_duration_predictions,
                     duration_targets, noise, src_lens, mel_lens):
    # These never contribute to any returned loss (postnet_mel_loss is computed but not
    # returned by the PyTorch module), so they are not DMA'd into the kernel at all.
    del mel_pred_diffusion, epsilon_denoise_prediction

    B, t_mel, n_mels = mel_pred_stylespeech.shape
    # module: mel_targets = mel_targets[:, :mel_masks.shape[1], :]
    mel_targets = mel_targets[:, :t_mel, :]

    # Lane-aligned frame tile: (tile_frames * n_mels) % 128 == 0, as large as useful but no
    # larger than the granule-rounded sequence (avoids huge padding at small test shapes).
    granule = 128 // math.gcd(n_mels, 128)
    tile_frames = max(granule, (_TARGET_TILE_FRAMES // granule) * granule)
    tile_frames = min(tile_frames, -(-t_mel // granule) * granule)
    n_tiles = -(-t_mel // tile_frames)
    t_pad = n_tiles * tile_frames
    tile_flat = tile_frames * n_mels

    def flatten_mel(x):
        x = x[:, :t_mel, :]
        if t_pad != t_mel:
            x = jnp.pad(x, ((0, 0), (0, t_pad - t_mel), (0, 0)))  # zeros; masked in-kernel
        return x.reshape(B, t_pad * n_mels)                       # lane-dense last axis

    mel_tgt_flat = flatten_mel(mel_targets)
    mel_ss_flat = flatten_mel(mel_pred_stylespeech)

    src_len_col = src_lens.astype(jnp.int32).reshape(B, 1)
    mel_len_col = mel_lens.astype(jnp.int32).reshape(B, 1)
    noise_2d = noise.reshape(B, -1)

    kernel = _make_kernel(
        n_mels=n_mels, tile_frames=tile_frames, noise_size=noise.size,
        pitch_phoneme=(PITCH_FEATURE_LEVEL == "phoneme_level"),
        energy_phoneme=(ENERGY_FEATURE_LEVEL == "phoneme_level"))

    def resident(arr):  # full-array block, constant index map -> DMA'd once, stays in VMEM
        return pl.BlockSpec(arr.shape, lambda t: (0, 0))

    grid_spec = pltpu.PrefetchScalarGridSpec(
        num_scalar_prefetch=0,
        grid=(n_tiles,),
        in_specs=[
            resident(src_len_col),
            resident(mel_len_col),
            pl.BlockSpec((B, tile_flat), lambda t: (0, t)),
            pl.BlockSpec((B, tile_flat), lambda t: (0, t)),
            resident(pitch_predictions),
            resident(pitch_targets),
            resident(energy_predictions),
            resident(energy_targets),
            resident(log_duration_predictions),
            resident(duration_targets),
            resident(noise_2d),
        ],
        out_specs=pl.BlockSpec(memory_space=pltpu.MemorySpace.SMEM),
        scratch_shapes=[pltpu.SMEM((8,), jnp.float32)],
    )

    out = pl.pallas_call(
        kernel,
        out_shape=jax.ShapeDtypeStruct((7,), jnp.float32),
        grid_spec=grid_spec,
        compiler_params=pltpu.CompilerParams(dimension_semantics=("arbitrary",)),
    )(src_len_col, mel_len_col, mel_tgt_flat, mel_ss_flat,
      pitch_predictions, pitch_targets, energy_predictions, energy_targets,
      log_duration_predictions, duration_targets.astype(jnp.int32), noise_2d)
    # [total, mel, mel_diffusion, pitch, energy, duration, noise]
    return out


def _reference(mel_tgt, mel_ss, pitch_p, pitch_t, energy_p, energy_t,
               logdur_p, dur_t, noise, src_lens, mel_lens):
    # pure-JAX reference of the PyTorch forward, for a sanity check
    f32 = jnp.float32
    B, T_mel, n_mels = mel_tgt.shape
    src_valid = (jnp.arange(logdur_p.shape[1])[None, :] < src_lens[:, None]).astype(f32)
    mel_valid = (jnp.arange(T_mel)[None, :] < mel_lens[:, None]).astype(f32)
    n_src, n_mel = src_valid.sum(), mel_valid.sum()
    mel_loss = (jnp.abs(mel_ss - mel_tgt) * mel_valid[:, :, None]).sum() / (n_mel * n_mels)
    if PITCH_FEATURE_LEVEL == "phoneme_level":
        pitch_loss = (((pitch_p - pitch_t) ** 2) * src_valid).sum() / n_src
    else:
        pitch_loss = (((pitch_p - pitch_t) ** 2) * mel_valid).sum() / n_mel
    if ENERGY_FEATURE_LEVEL == "phoneme_level":
        energy_loss = (((energy_p - energy_t) ** 2) * src_valid).sum() / n_src
    else:
        energy_loss = (((energy_p - energy_t) ** 2) * mel_valid).sum() / n_mel
    logdur_t = jnp.log(dur_t.astype(f32) + 1.0)
    duration_loss = (((logdur_p - logdur_t) ** 2) * src_valid).sum() / n_src
    noise_loss = noise.mean()
    total = mel_loss + duration_loss + pitch_loss + energy_loss + noise_loss
    return jnp.stack([total, mel_loss, mel_loss, pitch_loss, energy_loss,
                      duration_loss, noise_loss])


if __name__ == "__main__":
    B, T_SRC, T_MEL, N_MELS = 2, 8, 16, 32

    key = jax.random.PRNGKey(0)
    ks = jax.random.split(key, 12)

    mel_targets = jax.random.normal(ks[0], (B, T_MEL, N_MELS), jnp.float32)
    mel_pred_ss = jax.random.normal(ks[1], (B, T_MEL, N_MELS), jnp.float32)
    mel_pred_diff = jax.random.normal(ks[2], (B, T_MEL, N_MELS), jnp.float32)   # unused by losses
    eps_denoise = jax.random.normal(ks[3], (B, T_MEL, N_MELS), jnp.float32)     # unused by losses

    pitch_pred = jax.random.normal(ks[4], (B, T_SRC), jnp.float32)    # phoneme_level
    pitch_tgt = jax.random.normal(ks[5], (B, T_SRC), jnp.float32)
    energy_pred = jax.random.normal(ks[6], (B, T_MEL), jnp.float32)   # frame_level
    energy_tgt = jax.random.normal(ks[7], (B, T_MEL), jnp.float32)

    logdur_pred = jax.random.normal(ks[8], (B, T_SRC), jnp.float32)
    duration_tgt = jax.random.randint(ks[9], (B, T_SRC), 1, 5, jnp.int32)

    noise_tensor = jax.random.normal(ks[10], (B, T_MEL), jnp.float32)

    # per-sequence valid lengths (positions >= length are padded)
    src_lens = jnp.array([T_SRC, 5], jnp.int32)
    mel_lens = jnp.array([T_MEL, 10], jnp.int32)

    losses = fastspeech2_loss(mel_targets, mel_pred_ss, mel_pred_diff, eps_denoise,
                              pitch_pred, pitch_tgt, energy_pred, energy_tgt,
                              logdur_pred, duration_tgt, noise_tensor,
                              src_lens, mel_lens)
    losses = jax.block_until_ready(losses)

    ref = _reference(mel_targets, mel_pred_ss, pitch_pred, pitch_tgt, energy_pred,
                     energy_tgt, logdur_pred, duration_tgt, noise_tensor,
                     src_lens, mel_lens)
    assert jnp.allclose(losses, ref, atol=1e-4, rtol=1e-4), (losses, ref)

    print("KERNEL_OK")
</pallas_src>

<mosaic_0001>
module attributes {stable_mosaic.version = 11 : i64} {
  func.func @kernel(%arg0: i32, %arg1: memref<2x1xi32, #tpu.memory_space<vmem>>, %arg2: memref<2x1xi32, #tpu.memory_space<vmem>>, %arg3: memref<2x512xf32, #tpu.memory_space<vmem>>, %arg4: memref<2x512xf32, #tpu.memory_space<vmem>>, %arg5: memref<2x8xf32, #tpu.memory_space<vmem>>, %arg6: memref<2x8xf32, #tpu.memory_space<vmem>>, %arg7: memref<2x16xf32, #tpu.memory_space<vmem>>, %arg8: memref<2x16xf32, #tpu.memory_space<vmem>>, %arg9: memref<2x8xf32, #tpu.memory_space<vmem>>, %arg10: memref<2x8xi32, #tpu.memory_space<vmem>>, %arg11: memref<2x16xf32, #tpu.memory_space<vmem>>, %arg12: memref<7xf32, #tpu.memory_space<smem>>, %arg13: memref<8xf32, #tpu.memory_space<smem>>) attributes {dimension_semantics = [#tpu.dimension_semantics<arbitrary>], iteration_bounds = array<i64: 1>, scalar_prefetch = 0 : i64, scratch_operands = 1 : i64, tpu.core_type = #tpu.core_type<tc>, window_params = [{pipeline_mode = #tpu.pipeline_mode<synchronous>, transform_indices = @transform_0, window_bounds = array<i64: 2, 1>}, {pipeline_mode = #tpu.pipeline_mode<synchronous>, transform_indices = @transform_1, window_bounds = array<i64: 2, 1>}, {transform_indices = @transform_2, window_bounds = array<i64: 2, 512>}, {transform_indices = @transform_3, window_bounds = array<i64: 2, 512>}, {pipeline_mode = #tpu.pipeline_mode<synchronous>, transform_indices = @transform_4, window_bounds = array<i64: 2, 8>}, {pipeline_mode = #tpu.pipeline_mode<synchronous>, transform_indices = @transform_5, window_bounds = array<i64: 2, 8>}, {pipeline_mode = #tpu.pipeline_mode<synchronous>, transform_indices = @transform_6, window_bounds = array<i64: 2, 16>}, {pipeline_mode = #tpu.pipeline_mode<synchronous>, transform_indices = @transform_7, window_bounds = array<i64: 2, 16>}, {pipeline_mode = #tpu.pipeline_mode<synchronous>, transform_indices = @transform_8, window_bounds = array<i64: 2, 8>}, {pipeline_mode = #tpu.pipeline_mode<synchronous>, transform_indices = @transform_9, window_bounds = array<i64: 2, 8>}, {pipeline_mode = #tpu.pipeline_mode<synchronous>, transform_indices = @transform_10, window_bounds = array<i64: 2, 16>}, {transform_indices = @transform_11, window_bounds = array<i64: 7>}]} {
    %c0 = arith.constant 0 : index
    %c0_0 = arith.constant 0 : index
    %0 = vector.load %arg1[%c0, %c0_0] : memref<2x1xi32, #tpu.memory_space<vmem>>, vector<2x1xi32>
    %c0_1 = arith.constant 0 : index
    %c0_2 = arith.constant 0 : index
    %1 = vector.load %arg2[%c0_1, %c0_2] : memref<2x1xi32, #tpu.memory_space<vmem>>, vector<2x1xi32>
    %c0_i32 = arith.constant 0 : i32
    %2 = arith.cmpi eq, %arg0, %c0_i32 : i32
    %3 = arith.extui %2 : i1 to i32
    %c0_i32_3 = arith.constant 0 : i32
    %4 = arith.cmpi ne, %3, %c0_i32_3 : i32
    scf.if %4 {
      %cst_14 = arith.constant 0.000000e+00 : f32
      %c0_15 = arith.constant 0 : index
      %34 = memref.load %arg13[%c0_15] : memref<8xf32, #tpu.memory_space<smem>>
      memref.store %cst_14, %arg13[%c0_15] : memref<8xf32, #tpu.memory_space<smem>>
      %35 = tpu.iota {dimensions = array<i32: 1>} : vector<2x8xi32>
      %36 = vector.broadcast %0 : vector<2x1xi32> to vector<2x8xi32>
      %37 = arith.cmpi slt, %35, %36 : vector<2x8xi32>
      %38 = arith.extui %37 : vector<2x8xi1> to vector<2x8xi32>
      %39 = arith.sitofp %38 : vector<2x8xi32> to vector<2x8xf32>
      %c0_16 = arith.constant 0 : index
      %c0_17 = arith.constant 0 : index
      %40 = vector.load %arg5[%c0_16, %c0_17] : memref<2x8xf32, #tpu.memory_space<vmem>>, vector<2x8xf32>
      %c0_18 = arith.constant 0 : index
      %c0_19 = arith.constant 0 : index
      %41 = vector.load %arg6[%c0_18, %c0_19] : memref<2x8xf32, #tpu.memory_space<vmem>>, vector<2x8xf32>
      %42 = arith.subf %40, %41 : vector<2x8xf32>
      %43 = arith.mulf %42, %42 : vector<2x8xf32>
      %44 = arith.mulf %43, %39 : vector<2x8xf32>
      %45 = vector.shape_cast %44 : vector<2x8xf32> to vector<1x2x8xf32>
      %cst_20 = arith.constant dense<0.000000e+00> : vector<1xf32>
      %46 = vector.multi_reduction <add>, %45, %cst_20 [1, 2] : vector<1x2x8xf32> to vector<1xf32>
      %47 = vector.shape_cast %46 : vector<1xf32> to vector<1x1x1xf32>
      %48 = vector.extract %47[0, 0, 0] : f32 from vector<1x1x1xf32>
      %c1 = arith.constant 1 : index
      %49 = memref.load %arg13[%c1] : memref<8xf32, #tpu.memory_space<smem>>
      memref.store %48, %arg13[%c1] : memref<8xf32, #tpu.memory_space<smem>>
      %50 = tpu.iota {dimensions = array<i32: 1>} : vector<2x16xi32>
      %51 = vector.broadcast %1 : vector<2x1xi32> to vector<2x16xi32>
      %52 = arith.cmpi slt, %50, %51 : vector<2x16xi32>
      %53 = arith.extui %52 : vector<2x16xi1> to vector<2x16xi32>
      %54 = arith.sitofp %53 : vector<2x16xi32> to vector<2x16xf32>
      %c0_21 = arith.constant 0 : index
      %c0_22 = arith.constant 0 : index
      %55 = vector.load %arg7[%c0_21, %c0_22] : memref<2x16xf32, #tpu.memory_space<vmem>>, vector<2x16xf32>
      %c0_23 = arith.constant 0 : index
      %c0_24 = arith.constant 0 : index
      %56 = vector.load %arg8[%c0_23, %c0_24] : memref<2x16xf32, #tpu.memory_space<vmem>>, vector<2x16xf32>
      %57 = arith.subf %55, %56 : vector<2x16xf32>
      %58 = arith.mulf %57, %57 : vector<2x16xf32>
      %59 = arith.mulf %58, %54 : vector<2x16xf32>
      %60 = vector.shape_cast %59 : vector<2x16xf32> to vector<1x2x16xf32>
      %cst_25 = arith.constant dense<0.000000e+00> : vector<1xf32>
      %61 = vector.multi_reduction <add>, %60, %cst_25 [1, 2] : vector<1x2x16xf32> to vector<1xf32>
      %62 = vector.shape_cast %61 : vector<1xf32> to vector<1x1x1xf32>
      %63 = vector.extract %62[0, 0, 0] : f32 from vector<1x1x1xf32>
      %c2 = arith.constant 2 : index
      %64 = memref.load %arg13[%c2] : memref<8xf32, #tpu.memory_space<smem>>
      memref.store %63, %arg13[%c2] : memref<8xf32, #tpu.memory_space<smem>>
      %65 = tpu.iota {dimensions = array<i32: 1>} : vector<2x8xi32>
      %66 = vector.broadcast %0 : vector<2x1xi32> to vector<2x8xi32>
      %67 = arith.cmpi slt, %65, %66 : vector<2x8xi32>
      %68 = arith.extui %67 : vector<2x8xi1> to vector<2x8xi32>
      %69 = arith.sitofp %68 : vector<2x8xi32> to vector<2x8xf32>
      %c0_26 = arith.constant 0 : index
      %c0_27 = arith.constant 0 : index
      %70 = vector.load %arg10[%c0_26, %c0_27] : memref<2x8xi32, #tpu.memory_space<vmem>>, vector<2x8xi32>
      %71 = arith.sitofp %70 : vector<2x8xi32> to vector<2x8xf32>
      %cst_28 = arith.constant 1.000000e+00 : f32
      %72 = vector.broadcast %cst_28 : f32 to vector<2x8xf32>
      %73 = arith.addf %71, %72 : vector<2x8xf32>
      %74 = math.log %73 : vector<2x8xf32>
      %c0_29 = arith.constant 0 : index
      %c0_30 = arith.constant 0 : index
      %75 = vector.load %arg9[%c0_29, %c0_30] : memref<2x8xf32, #tpu.memory_space<vmem>>, vector<2x8xf32>
      %76 = arith.subf %75, %74 : vector<2x8xf32>
      %77 = arith.mulf %76, %76 : vector<2x8xf32>
      %78 = arith.mulf %77, %69 : vector<2x8xf32>
      %79 = vector.shape_cast %78 : vector<2x8xf32> to vector<1x2x8xf32>
      %cst_31 = arith.constant dense<0.000000e+00> : vector<1xf32>
      %80 = vector.multi_reduction <add>, %79, %cst_31 [1, 2] : vector<1x2x8xf32> to vector<1xf32>
      %81 = vector.shape_cast %80 : vector<1xf32> to vector<1x1x1xf32>
      %82 = vector.extract %81[0, 0, 0] : f32 from vector<1x1x1xf32>
      %c3 = arith.constant 3 : index
      %83 = memref.load %arg13[%c3] : memref<8xf32, #tpu.memory_space<smem>>
      memref.store %82, %arg13[%c3] : memref<8xf32, #tpu.memory_space<smem>>
      %c0_32 = arith.constant 0 : index
      %c0_33 = arith.constant 0 : index
      %84 = vector.load %arg11[%c0_32, %c0_33] : memref<2x16xf32, #tpu.memory_space<vmem>>, vector<2x16xf32>
      %85 = vector.shape_cast %84 : vector<2x16xf32> to vector<1x2x16xf32>
      %cst_34 = arith.constant dense<0.000000e+00> : vector<1xf32>
      %86 = vector.multi_reduction <add>, %85, %cst_34 [1, 2] : vector<1x2x16xf32> to vector<1xf32>
      %87 = vector.shape_cast %86 : vector<1xf32> to vector<1x1x1xf32>
      %88 = vector.extract %87[0, 0, 0] : f32 from vector<1x1x1xf32>
      %c4 = arith.constant 4 : index
      %89 = memref.load %arg13[%c4] : memref<8xf32, #tpu.memory_space<smem>>
      memref.store %88, %arg13[%c4] : memref<8xf32, #tpu.memory_space<smem>>
    } else {
    }
    %c16_i32 = arith.constant 16 : i32
    %5 = arith.muli %arg0, %c16_i32 : i32
    %6 = vector.broadcast %5 : i32 to vector<2x1xi32>
    %7 = arith.subi %1, %6 : vector<2x1xi32>
    %c0_i32_4 = arith.constant 0 : i32
    %c16_i32_5 = arith.constant 16 : i32
    %8 = vector.broadcast %c0_i32_4 : i32 to vector<2x1xi32>
    %9 = arith.maxsi %8, %7 : vector<2x1xi32>
    %10 = vector.broadcast %c16_i32_5 : i32 to vector<2x1xi32>
    %11 = arith.minsi %10, %9 : vector<2x1xi32>
    %12 = tpu.iota {dimensions = array<i32: 1>} : vector<2x512xi32>
    %c32_i32 = arith.constant 32 : i32
    %13 = vector.broadcast %c32_i32 : i32 to vector<2x1xi32>
    %14 = arith.muli %11, %13 : vector<2x1xi32>
    %15 = vector.broadcast %14 : vector<2x1xi32> to vector<2x512xi32>
    %16 = arith.cmpi slt, %12, %15 : vector<2x512xi32>
    %17 = arith.extui %16 : vector<2x512xi1> to vector<2x512xi32>
    %18 = arith.sitofp %17 : vector<2x512xi32> to vector<2x512xf32>
    %c0_6 = arith.constant 0 : index
    %c0_7 = arith.constant 0 : index
    %19 = vector.load %arg4[%c0_6, %c0_7] : memref<2x512xf32, #tpu.memory_space<vmem>>, vector<2x512xf32>
    %c0_8 = arith.constant 0 : index
    %c0_9 = arith.constant 0 : index
    %20 = vector.load %arg3[%c0_8, %c0_9] : memref<2x512xf32, #tpu.memory_space<vmem>>, vector<2x512xf32>
    %21 = arith.subf %19, %20 : vector<2x512xf32>
    %c0_10 = arith.constant 0 : index
    %22 = memref.load %arg13[%c0_10] : memref<8xf32, #tpu.memory_space<smem>>
    %23 = math.absf %21 : vector<2x512xf32>
    %24 = arith.mulf %23, %18 : vector<2x512xf32>
    %25 = vector.shape_cast %24 : vector<2x512xf32> to vector<1x2x512xf32>
    %cst = arith.constant dense<0.000000e+00> : vector<1xf32>
    %26 = vector.multi_reduction <add>, %25, %cst [1, 2] : vector<1x2x512xf32> to vector<1xf32>
    %27 = vector.shape_cast %26 : vector<1xf32> to vector<1x1x1xf32>
    %28 = vector.extract %27[0, 0, 0] : f32 from vector<1x1x1xf32>
    %29 = arith.addf %22, %28 : f32
    %c0_11 = arith.constant 0 : index
    %30 = memref.load %arg13[%c0_11] : memref<8xf32, #tpu.memory_space<smem>>
    memref.store %29, %arg13[%c0_11] : memref<8xf32, #tpu.memory_space<smem>>
    %c0_i32_12 = arith.constant 0 : i32
    %31 = arith.cmpi eq, %arg0, %c0_i32_12 : i32
    %32 = arith.extui %31 : i1 to i32
    %c0_i32_13 = arith.constant 0 : i32
    %33 = arith.cmpi ne, %32, %c0_i32_13 : i32
    scf.if %33 {
      %34 = arith.sitofp %0 : vector<2x1xi32> to vector<2x1xf32>
      %35 = vector.shape_cast %34 : vector<2x1xf32> to vector<1x2x1xf32>
      %cst_14 = arith.constant dense<0.000000e+00> : vector<1xf32>
      %36 = vector.multi_reduction <add>, %35, %cst_14 [1, 2] : vector<1x2x1xf32> to vector<1xf32>
      %37 = vector.shape_cast %36 : vector<1xf32> to vector<1x1x1xf32>
      %38 = vector.extract %37[0, 0, 0] : f32 from vector<1x1x1xf32>
      %39 = arith.sitofp %1 : vector<2x1xi32> to vector<2x1xf32>
      %40 = vector.shape_cast %39 : vector<2x1xf32> to vector<1x2x1xf32>
      %cst_15 = arith.constant dense<0.000000e+00> : vector<1xf32>
      %41 = vector.multi_reduction <add>, %40, %cst_15 [1, 2] : vector<1x2x1xf32> to vector<1xf32>
      %42 = vector.shape_cast %41 : vector<1xf32> to vector<1x1x1xf32>
      %43 = vector.extract %42[0, 0, 0] : f32 from vector<1x1x1xf32>
      %cst_16 = arith.constant 1.000000e+00 : f32
      %44 = arith.divf %cst_16, %38 : f32
      %cst_17 = arith.constant 1.000000e+00 : f32
      %45 = arith.divf %cst_17, %43 : f32
      %c0_18 = arith.constant 0 : index
      %46 = memref.load %arg13[%c0_18] : memref<8xf32, #tpu.memory_space<smem>>
      %47 = arith.mulf %46, %45 : f32
      %cst_19 = arith.constant 3.125000e-02 : f32
      %48 = arith.mulf %47, %cst_19 : f32
      %c1 = arith.constant 1 : index
      %49 = memref.load %arg13[%c1] : memref<8xf32, #tpu.memory_space<smem>>
      %50 = arith.mulf %49, %44 : f32
      %c2 = arith.constant 2 : index
      %51 = memref.load %arg13[%c2] : memref<8xf32, #tpu.memory_space<smem>>
      %52 = arith.mulf %51, %45 : f32
      %c3 = arith.constant 3 : index
      %53 = memref.load %arg13[%c3] : memref<8xf32, #tpu.memory_space<smem>>
      %54 = arith.mulf %53, %44 : f32
      %c4 = arith.constant 4 : index
      %55 = memref.load %arg13[%c4] : memref<8xf32, #tpu.memory_space<smem>>
      %cst_20 = arith.constant 3.125000e-02 : f32
      %56 = arith.mulf %55, %cst_20 : f32
      %57 = arith.addf %48, %54 : f32
      %58 = arith.addf %57, %50 : f32
      %59 = arith.addf %58, %52 : f32
      %60 = arith.addf %59, %56 : f32
      %c0_21 = arith.constant 0 : index
      %61 = memref.load %arg12[%c0_21] : memref<7xf32, #tpu.memory_space<smem>>
      memref.store %60, %arg12[%c0_21] : memref<7xf32, #tpu.memory_space<smem>>
      %c1_22 = arith.constant 1 : index
      %62 = memref.load %arg12[%c1_22] : memref<7xf32, #tpu.memory_space<smem>>
      memref.store %48, %arg12[%c1_22] : memref<7xf32, #tpu.memory_space<smem>>
      %c2_23 = arith.constant 2 : index
      %63 = memref.load %arg12[%c2_23] : memref<7xf32, #tpu.memory_space<smem>>
      memref.store %48, %arg12[%c2_23] : memref<7xf32, #tpu.memory_space<smem>>
      %c3_24 = arith.constant 3 : index
      %64 = memref.load %arg12[%c3_24] : memref<7xf32, #tpu.memory_space<smem>>
      memref.store %50, %arg12[%c3_24] : memref<7xf32, #tpu.memory_space<smem>>
      %c4_25 = arith.constant 4 : index
      %65 = memref.load %arg12[%c4_25] : memref<7xf32, #tpu.memory_space<smem>>
      memref.store %52, %arg12[%c4_25] : memref<7xf32, #tpu.memory_space<smem>>
      %c5 = arith.constant 5 : index
      %66 = memref.load %arg12[%c5] : memref<7xf32, #tpu.memory_space<smem>>
      memref.store %54, %arg12[%c5] : memref<7xf32, #tpu.memory_space<smem>>
      %c6 = arith.constant 6 : index
      %67 = memref.load %arg12[%c6] : memref<7xf32, #tpu.memory_space<smem>>
      memref.store %56, %arg12[%c6] : memref<7xf32, #tpu.memory_space<smem>>
    } else {
    }
    return
  }
  func.func @transform_0(%arg0: i32) -> (i32, i32) {
    %c0_i32 = arith.constant 0 : i32
    %c0_i32_0 = arith.constant 0 : i32
    %c0_i32_1 = arith.constant 0 : i32
    return %c0_i32, %c0_i32_0 : i32, i32
  }
  func.func @transform_1(%arg0: i32) -> (i32, i32) {
    %c0_i32 = arith.constant 0 : i32
    %c0_i32_0 = arith.constant 0 : i32
    %c0_i32_1 = arith.constant 0 : i32
    return %c0_i32, %c0_i32_0 : i32, i32
  }
  func.func @transform_2(%arg0: i32) -> (i32, i32) {
    %c0_i32 = arith.constant 0 : i32
    %c0_i32_0 = arith.constant 0 : i32
    return %c0_i32, %arg0 : i32, i32
  }
  func.func @transform_3(%arg0: i32) -> (i32, i32) {
    %c0_i32 = arith.constant 0 : i32
    %c0_i32_0 = arith.constant 0 : i32
    return %c0_i32, %arg0 : i32, i32
  }
  func.func @transform_4(%arg0: i32) -> (i32, i32) {
    %c0_i32 = arith.constant 0 : i32
    %c0_i32_0 = arith.constant 0 : i32
    %c0_i32_1 = arith.constant 0 : i32
    return %c0_i32, %c0_i32_0 : i32, i32
  }
  func.func @transform_5(%arg0: i32) -> (i32, i32) {
    %c0_i32 = arith.constant 0 : i32
    %c0_i32_0 = arith.constant 0 : i32
    %c0_i32_1 = arith.constant 0 : i32
    return %c0_i32, %c0_i32_0 : i32, i32
  }
  func.func @transform_6(%arg0: i32) -> (i32, i32) {
    %c0_i32 = arith.constant 0 : i32
    %c0_i32_0 = arith.constant 0 : i32
    %c0_i32_1 = arith.constant 0 : i32
    return %c0_i32, %c0_i32_0 : i32, i32
  }
  func.func @transform_7(%arg0: i32) -> (i32, i32) {
    %c0_i32 = arith.constant 0 : i32
    %c0_i32_0 = arith.constant 0 : i32
    %c0_i32_1 = arith.constant 0 : i32
    return %c0_i32, %c0_i32_0 : i32, i32
  }
  func.func @transform_8(%arg0: i32) -> (i32, i32) {
    %c0_i32 = arith.constant 0 : i32
    %c0_i32_0 = arith.constant 0 : i32
    %c0_i32_1 = arith.constant 0 : i32
    return %c0_i32, %c0_i32_0 : i32, i32
  }
  func.func @transform_9(%arg0: i32) -> (i32, i32) {
    %c0_i32 = arith.constant 0 : i32
    %c0_i32_0 = arith.constant 0 : i32
    %c0_i32_1 = arith.constant 0 : i32
    return %c0_i32, %c0_i32_0 : i32, i32
  }
  func.func @transform_10(%arg0: i32) -> (i32, i32) {
    %c0_i32 = arith.constant 0 : i32
    %c0_i32_0 = arith.constant 0 : i32
    %c0_i32_1 = arith.constant 0 : i32
    return %c0_i32, %c0_i32_0 : i32, i32
  }
  func.func @transform_11(%arg0: i32) -> i32 {
    %c0_i32 = arith.constant 0 : i32
    %c0_i32_0 = arith.constant 0 : i32
    return %c0_i32 : i32
  }
}

</mosaic_0001>

<bundles_post_ra>
// kernel: fastspeech2_loss.1
= control target key start
LH: loop header
LB: loop body
LE: loop exit
PB: predicated region body
PF: predicated region fallthrough
CT: control target
= control target key end

     0   :  { %v355_v1 = vmov 0   ;;  %s481_s0 = inlined_call_operand.vmem [shape: s32[2,1], index: 0, kind: input, shape index: {}]   ;;  %s482_s1 = inlined_call_operand.vmem [shape: s32[2,1], index: 1, kind: input, shape index: {}]   ;;  %s483_s2 = inlined_call_operand.vmem [shape: f32[2,512], index: 2, kind: input, shape index: {}]   ;;  %s484_s3 = inlined_call_operand.vmem [shape: f32[2,512], index: 3, kind: input, shape index: {}]   ;;  %s485_s4 = inlined_call_operand.vmem [shape: f32[2,8], index: 4, kind: input, shape index: {}]   ;;  %s486_s5 = inlined_call_operand.vmem [shape: f32[2,8], index: 5, kind: input, shape index: {}]   ;;  %s487_s6 = inlined_call_operand.vmem [shape: f32[2,16], index: 6, kind: input, shape index: {}]   ;;  %s488_s7 = inlined_call_operand.vmem [shape: f32[2,16], index: 7, kind: input, shape index: {}]   ;;  %s489_s8 = inlined_call_operand.vmem [shape: f32[2,8], index: 8, kind: input, shape index: {}]   ;;  %s490_s9 = inlined_call_operand.vmem [shape: s32[2,8], index: 9, kind: input, shape index: {}]   ;;  %s491_s10 = inlined_call_operand.vmem [shape: f32[2,16], index: 10, kind: input, shape index: {}]   ;;  %s492_s11 = inlined_call_operand.hbm [shape: f32[7], index: 11, kind: output, shape index: {}]  }
   0x1   :  { %v422_v0 = vld [vmem:[%s482_s1] sm:$0x3]  ;;  %336 = vset.pattern.permute.xlu1 %v355_v1  ;;  %335 = vset.pattern.permute.xlu0 %v355_v1 }
   0x2   :  { %vm134_vm0 = vcmp.gt.s32.totalorder %v422_v0, 0 }
   0x3   :  { %16 = vsyncpa [#allocation4], 0  ;;  %74 = vperm.xlu1 %336, %v422_v0   ;;  %v135_v2 = vsel %vm134_vm0, %v422_v0, 0  ;;  %v430_v5 = vld [vmem:[%s481_s0] sm:$0x3]  ;;  %vm84_vm2 = vcmask 123904   ;;  %v47_v13 = vlaneseq }
   0x4   :  { %vm136_vm1 = vcmp.lt.s32.totalorder %v135_v2, 16  ;;  %v118_v6 = vld [vmem:[%s491_s10] sm:$0x3]  ;;  %v356_v16 = vmov 1983009808   ;;  %v357_v27 = vmov 0.0   ;;  %v232_v57 = vcvt.s32.f32 %v430_v5 }
   0x5   :  { %v137_v3 = vsel %vm136_vm1, %v135_v2, 16  ;;  %v119_v7 = vsel %vm84_vm2, %v118_v6, 0.0  ;;  %v97_v8 = vld [vmem:[%s490_s9] sm:$0x3]  ;;  %v171_v17 = vunpack.c.l.s4 %v356_v16  ;;  %v48_v18 = vand.u32 127, %v47_v13  ;;  %s343_s10 = scalar_lea.hbm %s492_s11, 16 }
   0x6   :  { %v143_v4 = vmul.u32 32, %v137_v3  ;;  %v98_v9 = vcvt.s32.f32 %v97_v8  ;;  %v79_v11 = vld [vmem:[%s487_s6] sm:$0x3]  ;;  %v174_v21 = vshrl.u32 %v47_v13, 7  ;;  %vm60_vm9 = vcmask 58368   ;;  %p344_p0 = scmp.ne.s32.totalorder %s492_s11, %s343_s10  ;;  %p347_p1 = scmp.lt.u32.totalorder %s343_s10, %s492_s11 }
   0x7   :  { %v80_v12 = vld [vmem:[%s488_s7] sm:$0x3]  ;;  %v172_v23 = vunpack.c.0.s8 %v171_v17  ;;  %v140_v29 = vadd.s32 128, %v48_v18  ;;  %v141_v30 = vadd.s32 256, %v48_v18  ;;  %v142_v31 = vadd.s32 384, %v48_v18 }
   0x8   :  { %145 = vperm.xlu0 %335, %v143_v4   ;;  %v99_v10 = vadd.f32 1.0, %v98_v9  ;;  %v81_v14 = vsub.f32 %v79_v11, %v80_v12  ;;  %v102_v24 = vld [vmem:[%s489_s8] sm:$0x3]  ;;  %vm233_vm10 = vcmask 1024   ;;  %vm209_vm11 = vcmask 1041408   ;;  %p349_p2 = pnand %p347_p1, %p344_p0 }
   0x9   :  { %v55_v25 = vld [vmem:[%s485_s4] sm:$0x3]  ;;  %v175_v37 = vsub.s32 %v172_v23, %v174_v21  ;;  %v234_v61 = vsel %vm233_vm10, %v232_v57, 0.0 }
   0xa   :  { %337 = vlog2.f32 %v99_v10  ;;  %v82_v19 = vmul.f32 %v81_v14, %v81_v14  ;;  %v56_v26 = vld [vmem:[%s486_s5] sm:$0x3]  ;;  %v244_v10 = vcvt.s32.f32 %v422_v0 }
   0xb   :  { %v159_v32 = vld [vmem:[%s484_s3] sm:$0xff]  ;;  %v57_v36 = vsub.f32 %v55_v25, %v56_v26 }
   0xc   :  { %50 = vperm.xlu0 %335, %v430_v5   ;;  %v160_v33 = vld [vmem:[%s483_s2] sm:$0xff]  ;;  %v245_v12 = vsel %vm233_vm10, %v244_v10, 0.0 }
   0xd   :  { %v161_v40 = vsub.f32 %v159_v32, %v160_v33  ;;  %v58_v48 = vmul.f32 %v57_v36, %v57_v36 }
   0xf   :  { %v163_v52 = vand.u32 2147483647, %v161_v40 }
  0x14   :  { %v338_v15 = vpop.eup %337 }
  0x15   :  { %v101_v22 = vmul.f32 0.6931472, %v338_v15 }
  0x17   :  { %v103_v35 = vsub.f32 %v102_v24, %v101_v22 }
  0x19   :  { %v104_v47 = vmul.f32 %v103_v35, %v103_v35 }
  0x27   :  { %120 = vadd.xlane.f32.xlu1 %v119_v7 }
  0x82   :  { %v75_v20 = vpop.permute.xlu1 %74 }
  0x83   :  { %vm76_vm3 = vcmp.lt.s32.totalorder %v48_v18, %v75_v20 }
  0x84   :  { %v304_v28 = vsel %vm76_vm3, 1.0, %v357_v27 }
  0x85   :  { %v83_v34 = vmul.f32 %v304_v28, %v82_v19 }
  0x87   :  { %v146_v38 = vpop.permute.xlu0 %145  ;;  %v85_v39 = vsel %vm84_vm2, %v83_v34, 0.0 }
  0x88   :  { %vm147_vm4 = vcmp.lt.s32.totalorder %v48_v18, %v146_v38  ;;  %vm148_vm5 = vcmp.lt.s32.totalorder %v140_v29, %v146_v38  ;;  %vm149_vm6 = vcmp.lt.s32.totalorder %v141_v30, %v146_v38  ;;  %vm150_vm7 = vcmp.lt.s32.totalorder %v142_v31, %v146_v38  ;;  %86 = vadd.xlane.f32.xlu0 %v85_v39 }
  0x89   :  { %v305_v41 = vsel %vm147_vm4, 1.0, %v357_v27  ;;  %v306_v42 = vsel %vm148_vm5, 1.0, %v357_v27  ;;  %v307_v43 = vsel %vm149_vm6, 1.0, %v357_v27  ;;  %v308_v44 = vsel %vm150_vm7, 1.0, %v357_v27 }
  0x8a   :  { %v168_v45 = vcombine.low %v305_v41, %v306_v42  ;;  %v169_v46 = vcombine.low %v307_v43, %v308_v44 }
  0x8b   :  { %v51_v49 = vpop.permute.xlu0 %50 }
  0x8c   :  { %v176_v50 = vrot.slane %v168_v45, %v175_v37  ;;  %v183_v51 = vrot.slane %v169_v46, %v175_v37  ;;  %vm52_vm8 = vcmp.lt.s32.totalorder %v48_v18, %v51_v49 }
  0x8d   :  { %v303_v53 = vsel %vm52_vm8, 1.0, %v357_v27 }
  0x8e   :  { %v184_v54 = vcombine.low %v176_v50, %v183_v51  ;;  %v105_v55 = vmul.f32 %v303_v53, %v104_v47  ;;  %v59_v56 = vmul.f32 %v303_v53, %v58_v48 }
  0x90   :  { %v106_v58 = vsel %vm60_vm9, %v105_v55, 0.0  ;;  %v61_v59 = vsel %vm60_vm9, %v59_v56, 0.0  ;;  %v186_v60 = vmul.f32 %v184_v54, %v163_v52 }
  0x91   :  { %107 = vadd.xlane.f32.xlu0 %v106_v58  ;;  %62 = vadd.xlane.f32.xlu1 %v61_v59 }
  0x92   :  { %v188_v62 = vcombine.high %v186_v60, %v186_v60  ;;  %v195_v63 = vrot.slane %v186_v60, %v175_v37 }
  0x94   :  { %v202_v1 = vrot.slane %v188_v62, %v175_v37  ;;  %v203_v2 = vcombine.high %v195_v63, %v195_v63  ;;  %v210_v4 = vsel %vm209_vm11, %v195_v63, 0.0 }
  0x95   :  { %235 = vadd.xlane.f32.xlu1 %v234_v61 }
  0x96   :  { %v204_v3 = vcombine.high %v202_v1, %v202_v1  ;;  %v211_v6 = vsel %vm209_vm11, %v203_v2, 0.0  ;;  %v213_v8 = vsel %vm209_vm11, %v202_v1, 0.0 }
  0x97   :  { %v212_v7 = vadd.f32 %v211_v6, %v210_v4 }
  0x98   :  { %v215_v9 = vsel %vm209_vm11, %v204_v3, 0.0 }
  0x99   :  { %v214_v5 = vadd.f32 %v213_v8, %v212_v7 }
  0x9b   :  { %v216_v11 = vadd.f32 %v215_v9, %v214_v5 }
  0x9d   :  { %217 = vadd.xlane.f32.xlu0 %v216_v11 }
  0xa1   :  { %246 = vadd.xlane.f32.xlu0 %v245_v12 }
  0xb4   :  { %v121_v13 = vpop.xlane.xlu1 %120 }
  0xb5   :  { %v122_v15 = vrot.slane %v121_v13, 4 }
  0xb7   :  { %v123_v17 = vadd.f32 %v122_v15, %v121_v13 }
  0xb9   :  { %v124_v19 = vrot.slane %v123_v17, 2 }
  0xbb   :  { %v125_v28 = vadd.f32 %v124_v19, %v123_v17 }
  0xbd   :  { %v126_v36 = vrot.slane %v125_v28, 1 }
  0xbf   :  { %v127_v44 = vadd.f32 %v126_v36, %v125_v28 }
 0x115   :  { %v87_v14 = vpop.xlane.xlu0 %86 }
 0x116   :  { %v88_v16 = vrot.slane %v87_v14, 4 }
 0x118   :  { %v89_v18 = vadd.f32 %v88_v16, %v87_v14 }
 0x11a   :  { %v90_v20 = vrot.slane %v89_v18, 2 }
 0x11c   :  { %v91_v27 = vadd.f32 %v90_v20, %v89_v18 }
 0x11e   :  { %v63_v21 = vpop.xlane.xlu1 %62  ;;  %v108_v22 = vpop.xlane.xlu0 %107  ;;  %v92_v35 = vrot.slane %v91_v27, 1 }
 0x11f   :  { %v64_v23 = vrot.slane %v63_v21, 4  ;;  %v109_v24 = vrot.slane %v108_v22, 4 }
 0x120   :  { %v93_v43 = vadd.f32 %v92_v35, %v91_v27 }
 0x121   :  { %v65_v25 = vadd.f32 %v64_v23, %v63_v21  ;;  %v110_v26 = vadd.f32 %v109_v24, %v108_v22 }
 0x122   :  { %v236_v0 = vpop.xlane.xlu1 %235 }
 0x123   :  { %v66_v29 = vrot.slane %v65_v25, 2  ;;  %v111_v30 = vrot.slane %v110_v26, 2  ;;  %v237_v31 = vrot.slane %v236_v0, 4 }
 0x125   :  { %v67_v32 = vadd.f32 %v66_v29, %v65_v25  ;;  %v112_v33 = vadd.f32 %v111_v30, %v110_v26  ;;  %v238_v34 = vadd.f32 %v237_v31, %v236_v0 }
 0x127   :  { %v68_v37 = vrot.slane %v67_v32, 1  ;;  %v113_v38 = vrot.slane %v112_v33, 1  ;;  %v239_v41 = vrot.slane %v238_v34, 2 }
 0x129   :  { %v69_v39 = vadd.f32 %v68_v37, %v67_v32  ;;  %v114_v40 = vadd.f32 %v113_v38, %v112_v33  ;;  %v240_v47 = vadd.f32 %v239_v41, %v238_v34 }
 0x12a   :  { %v218_v42 = vpop.xlane.xlu0 %217 }
 0x12b   :  { %v219_v45 = vrot.slane %v218_v42, 4  ;;  %313 = vpush %v69_v39  ;;  %v241_v53 = vrot.slane %v240_v47, 1 }
 0x12c   :  { %315 = vpush %v93_v43 }
 0x12d   :  { %v220_v46 = vadd.f32 %v219_v45, %v218_v42  ;;  %317 = vpush %v114_v40  ;;  %v242_v58 = vadd.f32 %v241_v53, %v240_v47 }
 0x12e   :  { %319 = vpush %v127_v44  ;;  %v247_v48 = vpop.xlane.xlu0 %246 }
 0x12f   :  { %v221_v49 = vrot.slane %v220_v46, 2  ;;  %v248_v50 = vrot.slane %v247_v48, 4 }
 0x131   :  { %v249_v51 = vadd.f32 %v248_v50, %v247_v48  ;;  %v222_v52 = vadd.f32 %v221_v49, %v220_v46 }
 0x133   :  { %v250_v54 = vrot.slane %v249_v51, 2  ;;  %v223_v55 = vrot.slane %v222_v52, 1 }
 0x135   :  { %v251_v56 = vadd.f32 %v250_v54, %v249_v51  ;;  %v224_v57 = vadd.f32 %v223_v55, %v222_v52 }
 0x137   :  { %321 = vpush %v224_v57  ;;  %v252_v59 = vrot.slane %v251_v56, 1 }
 0x138   :  { %323 = vpush %v242_v58 }
 0x139   :  { %v253_v60 = vadd.f32 %v252_v59, %v251_v56 }
 0x13b   :  { %325 = vpush %v253_v60 }
 0x15c   :  { %s314_s2 = spop %313 }
 0x15d   :  { %s316_s3 = spop %315 }
 0x15e   :  { %s318_s4 = spop %317 }
 0x15f   :  { %s466_s5 = spop %319 }
 0x160   :  { %s271_s8 = smul.f32 0.03125, %s466_s5 }
 0x162   :  { %289 = sst [smem:[#allocation3 + $0x6]] %s271_s8 }
 0x168   :  { %s322_s14 = spop %321 }
 0x169   :  { %s324_s15 = spop %323 }
 0x16a   :  { %v255_v61 = vstv %s324_s15 }
 0x16b   :  { %339 = vrcp.f32 %v255_v61 }
 0x16c   :  { %s326_s16 = spop %325 }
 0x16d   :  { %v258_v62 = vstv %s326_s16 }
 0x16e   :  { %341 = vrcp.f32 %v258_v62 }
 0x175   :  { %v340_v63 = vpop.eup %339 }
 0x176   :  { %327 = vpush %v340_v63 }
 0x178   :  { %v342_v1 = vpop.eup %341 }
 0x179   :  { %329 = vpush %v342_v1 }
 0x1a7   :  { %s328_s17 = spop %327 }
 0x1a8   :  { %s265_s18 = smul.f32 %s328_s17, %s314_s2 }
 0x1a9   :  { %s269_s19 = smul.f32 %s328_s17, %s318_s4 }
 0x1aa   :  { %283 = sst [smem:[#allocation3 + $0x3]] %s265_s18  ;;  %s330_s20 = spop %329 }
 0x1ab   :  { %287 = sst [smem:[#allocation3 + $0x5]] %s269_s19  ;;  %s262_s1 = smul.f32 %s330_s20, %s322_s14 }
 0x1ac   :  { %s267_s21 = smul.f32 %s330_s20, %s316_s3 }
 0x1ad   :  { %s263_s22 = smul.f32 0.03125, %s262_s1 }
 0x1ae   :  { %285 = sst [smem:[#allocation3 + $0x4]] %s267_s21 }
 0x1af   :  { %s272_s23 = sadd.f32 %s269_s19, %s263_s22 }
 0x1b0   :  { %279 = sst [smem:[#allocation3 + $0x1]] %s263_s22 }
 0x1b1   :  { %s273_s24 = sadd.f32 %s272_s23, %s265_s18 }
 0x1b2   :  { %281 = sst [smem:[#allocation3 + $0x2]] %s263_s22 }
 0x1b3   :  { %s274_s0 = sadd.f32 %s273_s24, %s267_s21 }
 0x1b5   :  { %s275_s25 = sadd.f32 %s274_s0, %s271_s8 }
 0x1b7   :  { %277 = sst [smem:[#allocation3]] %s275_s25 }
 0x1b8   :  { %352 = shalt.err (!%p349_p2)
}
 0x1b9   :  { %s358_s29 = smov [#allocation3]  }
 0x1ba   :  { %297 = dma.smem_to_hbm %s358_s29, 16, %s492_s11, [#allocation4]  }
 0x1bb   :  { %353 = dma.done.wait [#allocation4], 16  }
 0x1bc   :  { %354 = vsyncadd [#allocation4], 4294967280 }
 0x1bd   :  { %301 = sfence }
 0x1be   :  { %302 = vsyncpa [#allocation4], 1 }

</bundles_post_ra>
